<compile_context>
chip_gen: v5e
topology: v5e:2x2
jax: 0.10.0
libtpu: 0.0.40
codegen_flags: <defaults>
</compile_context>

<pallas_src>
import math

import jax
import jax.numpy as jnp
from jax import lax
from jax.experimental import pallas as pl
from jax.experimental.pallas import tpu as pltpu


def _gelu_exact(x):
    # nn.GELU() default in PyTorch (approximate='none'): exact erf form.
    return 0.5 * x * (1.0 + lax.erf(x * (1.0 / math.sqrt(2.0))))


# ---------------------------------------------------------------------------
# Kernel 1: MLP + L2 normalize, one batch tile per grid step.
#   bf16 matmuls with f32 accumulation (MXU); GELU / normalize math in f32.
# ---------------------------------------------------------------------------
def _mlp_kernel(x_ref, w1_ref, b1_ref, w2_ref, b2_ref, w3_ref, b3_ref, z_ref):
    h = jnp.dot(x_ref[...], w1_ref[...],
                preferred_element_type=jnp.float32) + b1_ref[...]
    h = _gelu_exact(h)
    h = jnp.dot(h.astype(jnp.bfloat16), w2_ref[...],
                preferred_element_type=jnp.float32) + b2_ref[...]
    h = _gelu_exact(h)
    z = jnp.dot(h.astype(jnp.bfloat16), w3_ref[...],
                preferred_element_type=jnp.float32) + b3_ref[...]
    # F.normalize(z, dim=-1, p=2): z / max(||z||_2, 1e-12)
    inv_n = lax.rsqrt(jnp.maximum(jnp.sum(z * z, axis=-1, keepdims=True), 1e-24))
    z_ref[...] = (z * inv_n).astype(jnp.bfloat16)


# ---------------------------------------------------------------------------
# Kernel 2: weight-normalized last linear (weight_g == 1).
#   out = (z @ v^T) * inv_v ; inv_v is the precomputed f32 1/||v_row|| applied
#   to the f32 accumulator post-matmul (column scale of the [tb, tn] tile).
# ---------------------------------------------------------------------------
def _last_layer_kernel(z_ref, vt_ref, inv_ref, o_ref):
    s = jnp.dot(z_ref[...], vt_ref[...], preferred_element_type=jnp.float32)
    o_ref[...] = (s * inv_ref[...]).astype(o_ref.dtype)


def _vmem_cap_bytes():
    """Generation-aware VMEM budget (~75% of physical), safe fallback."""
    try:
        return int(0.75 * pltpu.get_tpu_info().vmem_capacity_bytes)
    except Exception:
        return 48 << 20  # conservative enough for v7x's 64 MiB physical VMEM


def dino_head_forward(x, params, *, tile_b=256, tile_out=4096):
    w1, b1, w2, b2, w3, b3, v = params
    B, in_dim = x.shape
    hidden = w1.shape[1]
    bneck = w3.shape[1]
    out_dim = v.shape[0]

    tile_b = min(tile_b, B)
    tile_out = min(tile_out, out_dim)
    # NOTE: ragged shapes are not handled (pad batch / out_dim if needed).
    assert B % tile_b == 0, "batch must be divisible by tile_b"
    assert out_dim % tile_out == 0, "out_dim must be divisible by tile_out"
    assert tile_b == B or tile_b % 8 == 0, "tile_b must be sublane-aligned"
    assert tile_out == out_dim or tile_out % 128 == 0, "tile_out must be lane-aligned"

    vmem_cap = _vmem_cap_bytes()

    # bf16 MXU feeds; biases / norms stay f32.
    x_bf = x.astype(jnp.bfloat16)
    w1_bf = w1.astype(jnp.bfloat16)
    w2_bf = w2.astype(jnp.bfloat16)
    w3_bf = w3.astype(jnp.bfloat16)
    # One-time XLA transpose: canonical [M,K] x [K,N] feed for the last layer.
    vt_bf = jnp.transpose(v).astype(jnp.bfloat16)                 # [bneck, out_dim]
    # f32 per-output-row inverse norms, applied post-matmul (weight_g == 1).
    inv_v = (1.0 / jnp.linalg.norm(v.astype(jnp.float32), axis=-1)
             ).reshape(1, out_dim)

    # ---- call 1: MLP + L2 normalize -> z [B, bneck] (bf16) -----------------
    mlp_vmem = (
        2 * (w1.size + w2.size + w3.size)          # bf16 weights, single copy
        + 4 * (b1.size + b2.size + b3.size)        # f32 biases
        + 2 * (tile_b * in_dim * 2)                # x tiles (double-buffered)
        + 2 * (tile_b * bneck * 2)                 # z tiles (double-buffered)
        + 2 * (tile_b * hidden * 4)                # f32 intermediates headroom
    )
    mlp_vmem = min(max(int(1.25 * mlp_vmem) + (2 << 20), 16 << 20), vmem_cap)

    # Whole-array VMEM residency (single-buffered) for the MLP weights/biases.
    weight_spec = pl.BlockSpec(memory_space=pltpu.MemorySpace.VMEM)

    z = pl.pallas_call(
        _mlp_kernel,
        out_shape=jax.ShapeDtypeStruct((B, bneck), jnp.bfloat16),
        grid_spec=pltpu.PrefetchScalarGridSpec(
            num_scalar_prefetch=0,
            grid=(B // tile_b,),
            in_specs=[
                pl.BlockSpec((tile_b, in_dim), lambda i: (i, 0)),   # x streamed
                weight_spec, weight_spec,                           # w1, b1
                weight_spec, weight_spec,                           # w2, b2
                weight_spec, weight_spec,                           # w3, b3
            ],
            out_specs=pl.BlockSpec((tile_b, bneck), lambda i: (i, 0)),
        ),
        compiler_params=pltpu.CompilerParams(
            dimension_semantics=("parallel",),
            vmem_limit_bytes=mlp_vmem,
        ),
    )(x_bf, w1_bf, b1, w2_bf, b2, w3_bf, b3)

    # ---- call 2: out = (z @ v^T) * inv_v, each v tile read from HBM once ---
    last_vmem = (
        2 * (bneck * tile_out * 2)                 # v^T tiles (double-buffered)
        + 2 * (tile_out * 4)                       # inv_v tiles
        + 2 * (tile_b * bneck * 2)                 # z tiles
        + 2 * (tile_b * tile_out * 4)              # out tiles (f32)
    )
    last_vmem = min(max(int(1.25 * last_vmem) + (2 << 20), 16 << 20), vmem_cap)

    out = pl.pallas_call(
        _last_layer_kernel,
        out_shape=jax.ShapeDtypeStruct((B, out_dim), jnp.float32),
        grid_spec=pltpu.PrefetchScalarGridSpec(
            num_scalar_prefetch=0,
            # out_dim tiles OUTER, batch tiles INNER: the v^T block index only
            # changes with the outer axis, so each v^T tile is DMA'd exactly
            # once per call (v is the dominant HBM traffic for big out_dim).
            grid=(out_dim // tile_out, B // tile_b),
            in_specs=[
                pl.BlockSpec((tile_b, bneck), lambda j, i: (i, 0)),    # z
                pl.BlockSpec((bneck, tile_out), lambda j, i: (0, j)),  # v^T
                pl.BlockSpec((1, tile_out), lambda j, i: (0, j)),      # inv_v
            ],
            out_specs=pl.BlockSpec((tile_b, tile_out), lambda j, i: (i, j)),
        ),
        compiler_params=pltpu.CompilerParams(
            # No cross-step dependency (no scratch) -> both axes independent;
            # megacore-shardable on v7x.
            dimension_semantics=("parallel", "parallel"),
            vmem_limit_bytes=last_vmem,
        ),
    )(z, vt_bf, inv_v)
    return out


def _reference_forward(x, params):
    """Plain-JAX f32 reference mirroring the PyTorch module exactly."""
    w1, b1, w2, b2, w3, b3, v = params
    h = jax.nn.gelu(x @ w1 + b1, approximate=False)
    h = jax.nn.gelu(h @ w2 + b2, approximate=False)
    z = h @ w3 + b3
    z = z / jnp.maximum(jnp.linalg.norm(z, axis=-1, keepdims=True), 1e-12)
    w_last = v / jnp.linalg.norm(v, axis=-1, keepdims=True)  # weight_g == 1
    return z @ w_last.T


def init_params(key, in_dim, hidden_dim, bottleneck_dim, out_dim):
    ks = jax.random.split(key, 7)
    scale = 0.05
    w1 = scale * jax.random.normal(ks[0], (in_dim, hidden_dim), jnp.float32)
    b1 = scale * jax.random.normal(ks[1], (1, hidden_dim), jnp.float32)
    w2 = scale * jax.random.normal(ks[2], (hidden_dim, hidden_dim), jnp.float32)
    b2 = scale * jax.random.normal(ks[3], (1, hidden_dim), jnp.float32)
    w3 = scale * jax.random.normal(ks[4], (hidden_dim, bottleneck_dim), jnp.float32)
    b3 = scale * jax.random.normal(ks[5], (1, bottleneck_dim), jnp.float32)
    v = scale * jax.random.normal(ks[6], (out_dim, bottleneck_dim), jnp.float32)
    return (w1, b1, w2, b2, w3, b3, v)


if __name__ == "__main__":
    # Small shapes consistent with the module (scaled-down DINO head), kept
    # lane-aligned where it matters.
    batch, in_dim, hidden_dim, bottleneck_dim, out_dim = 8, 64, 128, 128, 1024

    key = jax.random.PRNGKey(0)
    kx, kp = jax.random.split(key)
    x = jax.random.normal(kx, (batch, in_dim), jnp.float32)
    params = init_params(kp, in_dim, hidden_dim, bottleneck_dim, out_dim)

    out = dino_head_forward(x, params)
    out = jax.block_until_ready(out)

    ref = _reference_forward(x, params)
    assert out.shape == (batch, out_dim)
    # bf16 matmul feeds vs f32 reference -> loosened tolerance.
    assert jnp.allclose(out, ref, atol=2e-2, rtol=2e-2), (
        "mismatch vs reference, max abs err = "
        f"{float(jnp.max(jnp.abs(out - ref)))}")

    print("KERNEL_OK")
</pallas_src>

<mosaic_0001>
module attributes {stable_mosaic.version = 11 : i64} {
  func.func @_mlp_kernel(%arg0: i32, %arg1: memref<8x64xbf16, #tpu.memory_space<vmem>>, %arg2: memref<64x128xbf16, #tpu.memory_space<vmem>>, %arg3: memref<1x128xf32, #tpu.memory_space<vmem>>, %arg4: memref<128x128xbf16, #tpu.memory_space<vmem>>, %arg5: memref<1x128xf32, #tpu.memory_space<vmem>>, %arg6: memref<128x128xbf16, #tpu.memory_space<vmem>>, %arg7: memref<1x128xf32, #tpu.memory_space<vmem>>, %arg8: memref<8x128xbf16, #tpu.memory_space<vmem>>) attributes {dimension_semantics = [#tpu.dimension_semantics<parallel>], iteration_bounds = array<i64: 1>, scalar_prefetch = 0 : i64, scratch_operands = 0 : i64, tpu.core_type = #tpu.core_type<tc>, window_params = [{transform_indices = @transform_0, window_bounds = array<i64: 8, 64>}, {pipeline_mode = #tpu.pipeline_mode<synchronous>, transform_indices = @transform_1, window_bounds = array<i64: 64, 128>}, {pipeline_mode = #tpu.pipeline_mode<synchronous>, transform_indices = @transform_2, window_bounds = array<i64: 1, 128>}, {pipeline_mode = #tpu.pipeline_mode<synchronous>, transform_indices = @transform_3, window_bounds = array<i64: 128, 128>}, {pipeline_mode = #tpu.pipeline_mode<synchronous>, transform_indices = @transform_4, window_bounds = array<i64: 1, 128>}, {pipeline_mode = #tpu.pipeline_mode<synchronous>, transform_indices = @transform_5, window_bounds = array<i64: 128, 128>}, {pipeline_mode = #tpu.pipeline_mode<synchronous>, transform_indices = @transform_6, window_bounds = array<i64: 1, 128>}, {transform_indices = @transform_7, window_bounds = array<i64: 8, 128>}]} {
    %c0 = arith.constant 0 : index
    %c0_0 = arith.constant 0 : index
    %0 = vector.load %arg1[%c0, %c0_0] : memref<8x64xbf16, #tpu.memory_space<vmem>>, vector<8x64xbf16>
    %c0_1 = arith.constant 0 : index
    %c0_2 = arith.constant 0 : index
    %1 = vector.load %arg2[%c0_1, %c0_2] : memref<64x128xbf16, #tpu.memory_space<vmem>>, vector<64x128xbf16>
    %cst = arith.constant dense<0.000000e+00> : vector<8x128xf32>
    %2 = tpu.matmul %0, %1, %cst {dimension_numbers = #tpu.dot_dimension_numbers<[1], [0], [0], [1], [0, 0, 1, 1], [], []>} : vector<8x64xbf16>, vector<64x128xbf16>, vector<8x128xf32> -> vector<8x128xf32>
    %c0_3 = arith.constant 0 : index
    %c0_4 = arith.constant 0 : index
    %3 = vector.load %arg3[%c0_3, %c0_4] : memref<1x128xf32, #tpu.memory_space<vmem>>, vector<1x128xf32>
    %4 = vector.broadcast %3 : vector<1x128xf32> to vector<8x128xf32>
    %5 = arith.addf %2, %4 : vector<8x128xf32>
    %cst_5 = arith.constant 5.000000e-01 : f32
    %6 = vector.broadcast %cst_5 : f32 to vector<8x128xf32>
    %7 = arith.mulf %6, %5 : vector<8x128xf32>
    %cst_6 = arith.constant 0.707106769 : f32
    %8 = vector.broadcast %cst_6 : f32 to vector<8x128xf32>
    %9 = arith.mulf %5, %8 : vector<8x128xf32>
    %10 = math.erf %9 : vector<8x128xf32>
    %cst_7 = arith.constant 1.000000e+00 : f32
    %11 = vector.broadcast %cst_7 : f32 to vector<8x128xf32>
    %12 = arith.addf %11, %10 : vector<8x128xf32>
    %13 = arith.mulf %7, %12 : vector<8x128xf32>
    %14 = arith.truncf %13 : vector<8x128xf32> to vector<8x128xbf16>
    %c0_8 = arith.constant 0 : index
    %c0_9 = arith.constant 0 : index
    %15 = vector.load %arg4[%c0_8, %c0_9] : memref<128x128xbf16, #tpu.memory_space<vmem>>, vector<128x128xbf16>
    %cst_10 = arith.constant dense<0.000000e+00> : vector<8x128xf32>
    %16 = tpu.matmul %14, %15, %cst_10 {dimension_numbers = #tpu.dot_dimension_numbers<[1], [0], [0], [1], [0, 0, 1, 1], [], []>} : vector<8x128xbf16>, vector<128x128xbf16>, vector<8x128xf32> -> vector<8x128xf32>
    %c0_11 = arith.constant 0 : index
    %c0_12 = arith.constant 0 : index
    %17 = vector.load %arg5[%c0_11, %c0_12] : memref<1x128xf32, #tpu.memory_space<vmem>>, vector<1x128xf32>
    %18 = vector.broadcast %17 : vector<1x128xf32> to vector<8x128xf32>
    %19 = arith.addf %16, %18 : vector<8x128xf32>
    %cst_13 = arith.constant 5.000000e-01 : f32
    %20 = vector.broadcast %cst_13 : f32 to vector<8x128xf32>
    %21 = arith.mulf %20, %19 : vector<8x128xf32>
    %cst_14 = arith.constant 0.707106769 : f32
    %22 = vector.broadcast %cst_14 : f32 to vector<8x128xf32>
    %23 = arith.mulf %19, %22 : vector<8x128xf32>
    %24 = math.erf %23 : vector<8x128xf32>
    %cst_15 = arith.constant 1.000000e+00 : f32
    %25 = vector.broadcast %cst_15 : f32 to vector<8x128xf32>
    %26 = arith.addf %25, %24 : vector<8x128xf32>
    %27 = arith.mulf %21, %26 : vector<8x128xf32>
    %28 = arith.truncf %27 : vector<8x128xf32> to vector<8x128xbf16>
    %c0_16 = arith.constant 0 : index
    %c0_17 = arith.constant 0 : index
    %29 = vector.load %arg6[%c0_16, %c0_17] : memref<128x128xbf16, #tpu.memory_space<vmem>>, vector<128x128xbf16>
    %cst_18 = arith.constant dense<0.000000e+00> : vector<8x128xf32>
    %30 = tpu.matmul %28, %29, %cst_18 {dimension_numbers = #tpu.dot_dimension_numbers<[1], [0], [0], [1], [0, 0, 1, 1], [], []>} : vector<8x128xbf16>, vector<128x128xbf16>, vector<8x128xf32> -> vector<8x128xf32>
    %c0_19 = arith.constant 0 : index
    %c0_20 = arith.constant 0 : index
    %31 = vector.load %arg7[%c0_19, %c0_20] : memref<1x128xf32, #tpu.memory_space<vmem>>, vector<1x128xf32>
    %32 = vector.broadcast %31 : vector<1x128xf32> to vector<8x128xf32>
    %33 = arith.addf %30, %32 : vector<8x128xf32>
    %34 = arith.mulf %33, %33 : vector<8x128xf32>
    %cst_21 = arith.constant dense<0.000000e+00> : vector<8xf32>
    %35 = vector.multi_reduction <add>, %34, %cst_21 [1] : vector<8x128xf32> to vector<8xf32>
    %36 = vector.shape_cast %35 : vector<8xf32> to vector<8x1xf32>
    %cst_22 = arith.constant 1.000000e-24 : f32
    %37 = vector.broadcast %cst_22 : f32 to vector<8x1xf32>
    %38 = arith.maximumf %36, %37 : vector<8x1xf32>
    %39 = math.rsqrt %38 : vector<8x1xf32>
    %40 = vector.broadcast %39 : vector<8x1xf32> to vector<8x128xf32>
    %41 = arith.mulf %33, %40 : vector<8x128xf32>
    %42 = arith.truncf %41 : vector<8x128xf32> to vector<8x128xbf16>
    %c0_23 = arith.constant 0 : index
    %c0_24 = arith.constant 0 : index
    %43 = vector.load %arg8[%c0_23, %c0_24] : memref<8x128xbf16, #tpu.memory_space<vmem>>, vector<8x128xbf16>
    tpu.vector_store %arg8[%c0_23, %c0_24], %42 {strides = array<i32>} : memref<8x128xbf16, #tpu.memory_space<vmem>>, vector<8x128xbf16>,
    return
  }
  func.func @transform_0(%arg0: i32) -> (i32, i32) {
    %c0_i32 = arith.constant 0 : i32
    %c0_i32_0 = arith.constant 0 : i32
    return %arg0, %c0_i32 : i32, i32
  }
  func.func @transform_1(%arg0: i32) -> (i32, i32) {
    %c0_i32 = arith.constant 0 : i32
    %c0_i32_0 = arith.constant 0 : i32
    %c0_i32_1 = arith.constant 0 : i32
    return %c0_i32, %c0_i32_0 : i32, i32
  }
  func.func @transform_2(%arg0: i32) -> (i32, i32) {
    %c0_i32 = arith.constant 0 : i32
    %c0_i32_0 = arith.constant 0 : i32
    %c0_i32_1 = arith.constant 0 : i32
    return %c0_i32, %c0_i32_0 : i32, i32
  }
  func.func @transform_3(%arg0: i32) -> (i32, i32) {
    %c0_i32 = arith.constant 0 : i32
    %c0_i32_0 = arith.constant 0 : i32
    %c0_i32_1 = arith.constant 0 : i32
    return %c0_i32, %c0_i32_0 : i32, i32
  }
  func.func @transform_4(%arg0: i32) -> (i32, i32) {
    %c0_i32 = arith.constant 0 : i32
    %c0_i32_0 = arith.constant 0 : i32
    %c0_i32_1 = arith.constant 0 : i32
    return %c0_i32, %c0_i32_0 : i32, i32
  }
  func.func @transform_5(%arg0: i32) -> (i32, i32) {
    %c0_i32 = arith.constant 0 : i32
    %c0_i32_0 = arith.constant 0 : i32
    %c0_i32_1 = arith.constant 0 : i32
    return %c0_i32, %c0_i32_0 : i32, i32
  }
  func.func @transform_6(%arg0: i32) -> (i32, i32) {
    %c0_i32 = arith.constant 0 : i32
    %c0_i32_0 = arith.constant 0 : i32
    %c0_i32_1 = arith.constant 0 : i32
    return %c0_i32, %c0_i32_0 : i32, i32
  }
  func.func @transform_7(%arg0: i32) -> (i32, i32) {
    %c0_i32 = arith.constant 0 : i32
    %c0_i32_0 = arith.constant 0 : i32
    return %arg0, %c0_i32 : i32, i32
  }
}

</mosaic_0001>

<bundles_post_ra>
// kernel: tpu_custom_call.1
= control target key start
LH: loop header
LB: loop body
LE: loop exit
PB: predicated region body
PF: predicated region fallthrough
CT: control target
= control target key end

     0   :  { %12 = vsyncpa [#allocation3], 0  ;;  %s749_s0 = inlined_call_operand.hbm [shape: bf16[8,64], index: 0, kind: input, shape index: {}]   ;;  %s750_s1 = inlined_call_operand.hbm [shape: bf16[64,128], index: 1, kind: input, shape index: {}]   ;;  %s751_s2 = inlined_call_operand.vmem [shape: f32[1,128], index: 2, kind: input, shape index: {}]   ;;  %s752_s3 = inlined_call_operand.hbm [shape: bf16[128,128], index: 3, kind: input, shape index: {}]   ;;  %s753_s4 = inlined_call_operand.vmem [shape: f32[1,128], index: 4, kind: input, shape index: {}]   ;;  %s754_s5 = inlined_call_operand.hbm [shape: bf16[128,128], index: 5, kind: input, shape index: {}]   ;;  %s755_s6 = inlined_call_operand.vmem [shape: f32[1,128], index: 6, kind: input, shape index: {}]   ;;  %s756_s7 = inlined_call_operand.hbm [shape: bf16[8,128], index: 7, kind: output, shape index: {}]  }
   0x1   :  { %13 = vsyncpa [#allocation6], 0 }
   0x2   :  { %14 = vsyncpa [#allocation9], 0  ;;  %s31_s26 = sshll.u32 %s750_s1, 4  ;;  %s32_s26 = int_to_ptr.hbm [resolvable:$true] %s31_s26 }
   0x3   :  { %15 = vsyncpa [#allocation4], 0  ;;  %s678_s27 = smov [#allocation5]   ;;  %s21_s8 = sshll.u32 %s749_s0, 4  ;;  %s22_s8 = int_to_ptr.hbm [resolvable:$true] %s21_s8 }
   0x4   :  { %s33_s28 = sshll.u32 %s678_s27, 4  ;;  %s679_s9 = smov 64   ;;  %s34_s28 = int_to_ptr.vmem [resolvable:$true] %s33_s28 }
   0x5   :  { %s680_s10 = smov 4   ;;  %s681_s11 = smov [#allocation2]  }
   0x6   :  { %39 = dma.hbm_to_vmem [thread:$0]  %s32_s26, 512, %s34_s28, [#allocation6], %s679_s9, %s679_s9, %s680_s10  }
   0x7   :  { %s23_s12 = sshll.u32 %s681_s11, 4  ;;  %s46_s15 = sshll.u32 %s752_s3, 4  ;;  %s24_s12 = int_to_ptr.vmem [resolvable:$true] %s23_s12  ;;  %s47_s15 = int_to_ptr.hbm [resolvable:$true] %s46_s15 }
   0x8   :  { %26 = dma.hbm_to_vmem [thread:$0]  %s22_s8, 64, %s24_s12, [#allocation3]  }
   0x9   :  { %s61_s17 = sshll.u32 %s754_s5, 4  ;;  %s682_s18 = smov [#allocation7]   ;;  %s62_s17 = int_to_ptr.hbm [resolvable:$true] %s61_s17 }
   0xa   :  { %s48_s19 = sshll.u32 %s682_s18, 4  ;;  %s683_s0 = smov [#allocation8]   ;;  %s49_s19 = int_to_ptr.vmem [resolvable:$true] %s48_s19 }
   0xb   :  { %54 = dma.hbm_to_vmem [thread:$0]  %s47_s15, 1024, %s49_s19, [#allocation6], %s679_s9, %s679_s9, %s680_s10  }
   0xc   :  { %s63_s20 = sshll.u32 %s683_s0, 4  ;;  %s64_s20 = int_to_ptr.vmem [resolvable:$true] %s63_s20 }
   0xd   :  { %69 = dma.hbm_to_vmem [thread:$0]  %s62_s17, 1024, %s64_s20, [#allocation9], %s679_s9, %s679_s9, %s680_s10  }
   0xe   :  { %670 = dma.done.wait [#allocation3], 64  }
   0xf   :  { %671 = vsyncadd [#allocation3], 4294967232 }
  0x10   :  { %672 = dma.done.wait [#allocation6], 1536  }
  0x11   :  { %673 = vsyncadd [#allocation6], 4294965760 }
  0x12   :  { %674 = dma.done.wait [#allocation9], 1024  }
  0x13   :  { %675 = vsyncadd [#allocation9], 4294966272  ;;  %v517_v0 = vld [vmem:[#allocation5 + $0x18] sm:$0xff]  ;;  %v516_v1 = vld [vmem:[#allocation5 + $0x10] sm:$0xff]  ;;  %vm126_vm0 = vcmask 523264   ;;  %s684_s23 = smov [#allocation10]  }
  0x14   :  { %134 = vmatpush.bf16.msra.mxu0 %v517_v0  ;;  %v515_v2 = vld [vmem:[#allocation5 + $0x8] sm:$0xff]  ;;  %v514_v3 = vld [vmem:[#allocation5] sm:$0xff]  ;;  %v89_v4 = vld [vmem:[#allocation2] sm:$0xf]  ;;  %s419_s26 = sshll.u32 %s756_s7, 4  ;;  %s420_s26 = int_to_ptr.hbm [resolvable:$true] %s419_s26 }
  0x15   :  { %v525_v5 = vld [vmem:[#allocation7 + $0x38] sm:$0xff]  ;;  %v524_v6 = vld [vmem:[#allocation7 + $0x30] sm:$0xff]  ;;  %v523_v8 = vld [vmem:[#allocation7 + $0x28] sm:$0xff] }
  0x16   :  { %256 = vmatpush.bf16.msra.mxu1 %v525_v5  ;;  %v541_v7 = vld [vmem:[%s751_s2] ss:$0 sm:$0xff]  ;;  %v522_v11 = vld [vmem:[#allocation7 + $0x20] sm:$0xff]  ;;  %v520_v18 = vld [vmem:[#allocation7 + $0x10] sm:$0xff] }
  0x17   :  { %v521_v14 = vld [vmem:[#allocation7 + $0x18] sm:$0xff]  ;;  %v519_v23 = vld [vmem:[#allocation7 + $0x8] sm:$0xff]  ;;  %v518_v27 = vld [vmem:[#allocation7] sm:$0xff] }
  0x18   :  { %135 = vmatpush.bf16.msra.mxu0 %v516_v1  ;;  %v533_v57 = vld [vmem:[#allocation8 + $0x38] sm:$0xff]  ;;  %v532_v58 = vld [vmem:[#allocation8 + $0x30] sm:$0xff]  ;;  %v531_v60 = vld [vmem:[#allocation8 + $0x28] sm:$0xff] }
  0x19   :  { %382 = vmatpush.bf16.msra.mxu2 %v533_v57  ;;  %v542_v59 = vld [vmem:[%s753_s4] ss:$0 sm:$0xff]  ;;  %v530_v63 = vld [vmem:[#allocation8 + $0x20] sm:$0xff] }
  0x1a   :  { %257 = vmatpush.bf16.msra.mxu1 %v524_v6 }
  0x1c   :  { %136 = vmatpush.bf16.msra.mxu0 %v515_v2  ;;  %v529_v2 = vld [vmem:[#allocation8 + $0x18] sm:$0xff] }
  0x1d   :  { %383 = vmatpush.bf16.msra.mxu2 %v532_v58 }
  0x1e   :  { %258 = vmatpush.bf16.msra.mxu1 %v523_v8 }
  0x20   :  { %137 = vmatpush.bf16.msra.mxu0 %v514_v3 }
  0x21   :  { %384 = vmatpush.bf16.msra.mxu2 %v531_v60 }
  0x22   :  { %259 = vmatpush.bf16.msra.mxu1 %v522_v11 }
  0x23   :  { %447 = vmatmul.msk.bf16.vlgmr.msra.gmra.mxu0 %vm126_vm0, %v89_v4 }
  0x25   :  { %385 = vmatpush.bf16.msra.mxu2 %v530_v63 }
  0x26   :  { %260 = vmatpush.bf16.msra.mxu1 %v521_v14 }
  0x29   :  { %386 = vmatpush.bf16.msra.mxu2 %v529_v2 }
  0x2a   :  { %261 = vmatpush.bf16.msra.mxu1 %v520_v18 }
  0x2e   :  { %262 = vmatpush.bf16.msra.mxu1 %v519_v23 }
  0x32   :  { %263 = vmatpush.bf16.msra.mxu1 %v518_v27 }
  0xa0   :  { %v139_v9 = vpop.f32.mrf.mxu0 }
  0xa1   :  { %v140_v10 = vadd.f32 %v541_v7, %v139_v9  ;;  %v528_v7 = vld [vmem:[#allocation8 + $0x10] sm:$0xff] }
  0xa2   :  { %387 = vmatpush.bf16.msra.mxu2 %v528_v7 }
  0xa3   :  { %v144_v12 = vmul.f32 0.70710677, %v140_v10  ;;  %v143_v53 = vmul.f32 0.5, %v140_v10 }
  0xa5   :  { %v145_v13 = vmul.f32 %v144_v12, %v144_v12 }
  0xa7   :  { %v146_v15 = vmin.f32 %v145_v13, 16.0 }
  0xa8   :  { %v141_v16 = vpop.f32.mrf.mxu0 }
  0xa9   :  { %v147_v17 = vmul.f32 2.1237322e-06, %v146_v15  ;;  %v158_v19 = vmul.f32 3.8918573e-05, %v146_v15  ;;  %v526_v16 = vld [vmem:[#allocation8] sm:$0xff] }
  0xab   :  { %v148_v20 = vadd.f32 0.00028619796, %v147_v17  ;;  %v159_v21 = vadd.f32 0.001143296, %v158_v19 }
  0xad   :  { %v149_v22 = vmul.f32 %v148_v20, %v146_v15  ;;  %v160_v24 = vmul.f32 %v159_v21, %v146_v15 }
  0xaf   :  { %v161_v25 = vadd.f32 0.014752088, %v160_v24  ;;  %v150_v26 = vadd.f32 0.0036580483, %v149_v22 }
  0xb1   :  { %v162_v28 = vmul.f32 %v161_v25, %v146_v15  ;;  %v151_v30 = vmul.f32 %v150_v26, %v146_v15 }
  0xb3   :  { %v163_v29 = vadd.f32 0.112945676, %v162_v28  ;;  %v152_v33 = vadd.f32 0.05243302, %v151_v30 }
  0xb5   :  { %v164_v31 = vmul.f32 %v163_v29, %v146_v15  ;;  %v153_v36 = vmul.f32 %v152_v33, %v146_v15 }
  0xb7   :  { %v165_v32 = vadd.f32 0.4994258, %v164_v31  ;;  %v154_v37 = vadd.f32 0.18741608, %v153_v36 }
  0xb9   :  { %v166_v34 = vmul.f32 %v165_v32, %v146_v15  ;;  %v155_v39 = vmul.f32 %v154_v37, %v146_v15 }
  0xbb   :  { %v167_v35 = vadd.f32 1.0, %v166_v34  ;;  %v156_v43 = vadd.f32 1.1283791, %v155_v39 }
  0xbd   :  { %544 = vrcp.f32 %v167_v35  ;;  %v179_v42 = vand.u32 2147483648, %v167_v35  ;;  %v177_v45 = vand.u32 2147483647, %v167_v35  ;;  %vm173_vm2 = vweird.f32 %v167_v35 }
  0xbe   :  { %v157_v48 = vmul.f32 %v156_v43, %v144_v12  ;;  %v527_v12 = vld [vmem:[#allocation8 + $0x8] sm:$0xff] }
  0xbf   :  { %v180_v47 = vor.u32 1.1754944e-38, %v179_v42  ;;  %vm178_vm4 = vcmp.eq.f32.partialorder %v177_v45, 8.507059e+37  ;;  %388 = vmatpush.bf16.msra.mxu2 %v527_v12  ;;  %v543_v45 = vld [vmem:[%s755_s6] ss:$0 sm:$0xff]  ;;  %s417_s6 = sshll.u32 %s684_s23, 4  ;;  %s418_s6 = int_to_ptr.vmem [resolvable:$true] %s417_s6 }
  0xc3   :  { %v545_v38 = vpop.eup %544  ;;  %389 = vmatpush.bf16.msra.mxu2 %v526_v16 }
  0xc4   :  { %v169_v40 = vmul.f32 %v545_v38, %v167_v35  ;;  %vm174_vm1 = vweird.f32 %v545_v38 }
  0xc5   :  { %vm175_vm3 = vmor %vm173_vm2, %vm174_vm1 }
  0xc6   :  { %v170_v41 = vsub.f32 1.0, %v169_v40 }
  0xc8   :  { %v171_v44 = vmul.f32 %v545_v38, %v170_v41 }
  0xca   :  { %v172_v46 = vadd.f32 %v545_v38, %v171_v44 }
  0xcc   :  { %v176_v49 = vsel %vm175_vm3, %v545_v38, %v172_v46 }
  0xcd   :  { %v181_v50 = vsel %vm178_vm4, %v180_v47, %v176_v49 }
  0xce   :  { %v182_v51 = vmul.f32 %v181_v50, %v157_v48 }
  0xd0   :  { %v448_v52 = vclamps-f32 %v182_v51, 1.0 }
  0xd2   :  { %v185_v54 = vadd.f32 1.0, %v448_v52 }
  0xd4   :  { %v186_v55 = vmul.f32 %v185_v54, %v143_v53 }
  0xd6   :  { %v187_v56 = vpack.c.bf16 %v186_v55, %v186_v55 }
  0xd8   :  { %264 = vmatmul.bf16.vlgmr.msra.gmra.mxu1 %v187_v56 }
 0x155   :  { %v265_v61 = vpop.f32.mrf.mxu1 }
 0x156   :  { %v266_v62 = vadd.f32 %v542_v59, %v265_v61 }
 0x158   :  { %v270_v0 = vmul.f32 0.70710677, %v266_v62  ;;  %v269_v41 = vmul.f32 0.5, %v266_v62 }
 0x15a   :  { %v271_v1 = vmul.f32 %v270_v0, %v270_v0 }
 0x15c   :  { %v272_v3 = vmin.f32 %v271_v1, 16.0 }
 0x15d   :  { %v267_v4 = vpop.f32.mrf.mxu1 }
 0x15e   :  { %v273_v5 = vmul.f32 2.1237322e-06, %v272_v3  ;;  %v284_v6 = vmul.f32 3.8918573e-05, %v272_v3 }
 0x160   :  { %v274_v8 = vadd.f32 0.00028619796, %v273_v5  ;;  %v285_v9 = vadd.f32 0.001143296, %v284_v6 }
 0x162   :  { %v275_v10 = vmul.f32 %v274_v8, %v272_v3  ;;  %v286_v11 = vmul.f32 %v285_v9, %v272_v3 }
 0x164   :  { %v287_v13 = vadd.f32 0.014752088, %v286_v11  ;;  %v276_v14 = vadd.f32 0.0036580483, %v275_v10 }
 0x166   :  { %v288_v15 = vmul.f32 %v287_v13, %v272_v3  ;;  %v277_v18 = vmul.f32 %v276_v14, %v272_v3 }
 0x168   :  { %v289_v17 = vadd.f32 0.112945676, %v288_v15  ;;  %v278_v21 = vadd.f32 0.05243302, %v277_v18 }
 0x16a   :  { %v290_v19 = vmul.f32 %v289_v17, %v272_v3  ;;  %v279_v24 = vmul.f32 %v278_v21, %v272_v3 }
 0x16c   :  { %v291_v20 = vadd.f32 0.4994258, %v290_v19  ;;  %v280_v25 = vadd.f32 0.18741608, %v279_v24 }
 0x16e   :  { %v292_v22 = vmul.f32 %v291_v20, %v272_v3  ;;  %v281_v27 = vmul.f32 %v280_v25, %v272_v3 }
 0x170   :  { %v293_v23 = vadd.f32 1.0, %v292_v22  ;;  %v282_v31 = vadd.f32 1.1283791, %v281_v27 }
 0x172   :  { %546 = vrcp.f32 %v293_v23  ;;  %v305_v30 = vand.u32 2147483648, %v293_v23  ;;  %v303_v33 = vand.u32 2147483647, %v293_v23  ;;  %vm299_vm6 = vweird.f32 %v293_v23 }
 0x173   :  { %v283_v36 = vmul.f32 %v282_v31, %v270_v0 }
 0x174   :  { %v306_v35 = vor.u32 1.1754944e-38, %v305_v30  ;;  %vm304_vm8 = vcmp.eq.f32.partialorder %v303_v33, 8.507059e+37 }
 0x178   :  { %v547_v26 = vpop.eup %546 }
 0x179   :  { %v295_v28 = vmul.f32 %v547_v26, %v293_v23  ;;  %vm300_vm5 = vweird.f32 %v547_v26 }
 0x17a   :  { %vm301_vm7 = vmor %vm299_vm6, %vm300_vm5 }
 0x17b   :  { %v296_v29 = vsub.f32 1.0, %v295_v28 }
 0x17d   :  { %v297_v32 = vmul.f32 %v547_v26, %v296_v29 }
 0x17f   :  { %v298_v34 = vadd.f32 %v547_v26, %v297_v32 }
 0x181   :  { %v302_v37 = vsel %vm301_vm7, %v547_v26, %v298_v34 }
 0x182   :  { %v307_v38 = vsel %vm304_vm8, %v306_v35, %v302_v37 }
 0x183   :  { %v308_v39 = vmul.f32 %v307_v38, %v283_v36 }
 0x185   :  { %v481_v40 = vclamps-f32 %v308_v39, 1.0 }
 0x187   :  { %v311_v42 = vadd.f32 1.0, %v481_v40 }
 0x189   :  { %v312_v43 = vmul.f32 %v311_v42, %v269_v41 }
 0x18b   :  { %v313_v44 = vpack.c.bf16 %v312_v43, %v312_v43 }
 0x18d   :  { %390 = vmatmul.bf16.vlgmr.msra.gmra.mxu2 %v313_v44 }
 0x210   :  { %v391_v46 = vpop.f32.mrf.mxu2 }
 0x211   :  { %v392_v47 = vadd.f32 %v543_v45, %v391_v46 }
 0x213   :  { %v395_v48 = vmul.f32 %v392_v47, %v392_v47 }
 0x215   :  { %396 = vadd.xlane.f32.xlu0 %v395_v48 }
 0x218   :  { %v393_v49 = vpop.f32.mrf.mxu2 }
 0x288   :  { %v397_v50 = vpop.xlane.xlu0 %396 }
 0x289   :  { %v398_v51 = vmax.f32 %v397_v50, 1e-24 }
 0x28b   :  { %548 = vrsqrt.f32 %v398_v51  ;;  %vm405_vm10 = vweird.f32 %v398_v51 }
 0x291   :  { %v549_v52 = vpop.eup %548 }
 0x292   :  { %v400_v53 = vmul.f32 %v549_v52, %v398_v51  ;;  %vm406_vm9 = vweird.f32 %v549_v52 }
 0x293   :  { %vm407_vm11 = vmor %vm405_vm10, %vm406_vm9 }
 0x294   :  { %v401_v54 = vmul.f32 %v549_v52, %v400_v53 }
 0x296   :  { %v402_v55 = vmul.f32 0.5, %v401_v54 }
 0x298   :  { %v403_v56 = vsub.f32 1.5, %v402_v55 }
 0x29a   :  { %v404_v57 = vmul.f32 %v549_v52, %v403_v56 }
 0x29c   :  { %v408_v58 = vsel %vm407_vm11, %v549_v52, %v404_v57 }
 0x29d   :  { %v409_v59 = vmul.f32 %v408_v58, %v392_v47 }
 0x29f   :  { %v410_v60 = vpack.c.bf16 %v409_v59, %v409_v59 }
 0x2a1   :  { %411 = vst [vmem:[#allocation10] sm:$0xf] %v410_v60 }
 0x2a2   :  { %422 = dma.vmem_to_hbm [thread:$0]  %s418_s6, 64, %s420_s26, [#allocation4]  }
 0x2a3   :  { %676 = dma.done.wait [#allocation4], 64  }
 0x2a4   :  { %677 = vsyncadd [#allocation4], 4294967232 }
 0x2a5   :  { %427 = vsyncpa [#allocation3], 1 }
 0x2a6   :  { %428 = vsyncpa [#allocation6], 1 }
 0x2a7   :  { %429 = vsyncpa [#allocation9], 1 }
 0x2a8   :  { %430 = vsyncpa [#allocation4], 1 }

</bundles_post_ra>
